<compile_context>
chip_gen: v7x
topology: tpu7x:2x2x1
jax: 0.10.0
libtpu: 0.0.40
codegen_flags: <defaults>
</compile_context>

<pallas_src>
import jax
import jax.numpy as jnp
from jax import lax
from jax.experimental import pallas as pl
from jax.experimental.pallas import tpu as pltpu


def _lm_head_kernel(x_ref, w_ref, o_ref):
    # x_ref: [tm, H]  activations (batch-first rows, resident across vocab axis)
    # w_ref: [tn, H]  row tile of the *untransposed* embedding table
    # o_ref: [tm, tn] logits tile
    # Contract both operands on H: the [V,H] table is never transposed in HBM
    # and feeds the MXU as-is; accumulation is f32 via preferred_element_type.
    o_ref[...] = lax.dot_general(
        x_ref[...],
        w_ref[...],
        dimension_numbers=(((1,), (1,)), ((), ())),
        preferred_element_type=jnp.float32,
    ).astype(o_ref.dtype)


def _default_tiling():
    """Generation-specific (tm, tn, vmem_limit_bytes)."""
    kind = ""
    try:
        kind = jax.devices()[0].device_kind.lower()
    except Exception:
        pass
    mib = 1024 * 1024
    if "v7" in kind:
        # 64 MiB physical VMEM per TC: 1024x1024 tiles double-buffer in ~30 MiB,
        # leave headroom for Mosaic internal scratch (avoid 48 MiB+ caps here).
        return 1024, 1024, 44 * mib
    if "v6" in kind:
        # 128 MiB VMEM: large tiles push intensity toward the ~680 FLOP/byte
        # break-even (~3x fewer weight bytes streamed than 256/512 tiles).
        return 1024, 2048, 96 * mib
    if "v5" in kind:
        # v5e break-even ~240 FLOP/byte: 512/1024 already reaches the roofline.
        return 512, 1024, 64 * mib
    # Unknown chip: conservative settings that fit any >=64 MiB VMEM part.
    return 512, 1024, 44 * mib


def _build_lm_head_call(M, H, V, tm, tn, x_dtype, w_dtype, out_dtype,
                        vmem_limit_bytes, single_buffer_x):
    grid = (pl.cdiv(M, tm), pl.cdiv(V, tn))

    if single_buffer_x:
        # The x tile's index_map is constant across the inner (vocab) axis, so
        # it stays resident; a second pipeline buffer for it is wasted VMEM.
        x_spec = pl.BlockSpec((tm, H), lambda i, j: (i, 0),
                              pipeline_mode=pl.Buffered(1))
    else:
        x_spec = pl.BlockSpec((tm, H), lambda i, j: (i, 0))

    # Actual HBM streaming: x read once, weight re-read ceil(M/tm) times,
    # logits written once at out_dtype.
    m_passes = pl.cdiv(M, tm)
    cost = pl.CostEstimate(
        flops=2 * M * H * V,
        transcendentals=0,
        bytes_accessed=(M * H * jnp.dtype(x_dtype).itemsize
                        + m_passes * V * H * jnp.dtype(w_dtype).itemsize
                        + M * V * jnp.dtype(out_dtype).itemsize),
    )

    return pl.pallas_call(
        _lm_head_kernel,
        out_shape=jax.ShapeDtypeStruct((M, V), out_dtype),
        grid_spec=pltpu.PrefetchScalarGridSpec(
            num_scalar_prefetch=0,
            grid=grid,
            in_specs=[
                x_spec,
                # Row tile of the original [V, H] weight, streamed along the
                # innermost grid axis (no HBM transpose of the table).
                pl.BlockSpec((tn, H), lambda i, j: (j, 0)),
            ],
            out_specs=pl.BlockSpec((tm, tn), lambda i, j: (i, j)),
        ),
        compiler_params=pltpu.CompilerParams(
            # No K tiling -> no accumulator -> both axes fully independent.
            dimension_semantics=("parallel", "parallel"),
            vmem_limit_bytes=vmem_limit_bytes,
        ),
        cost_estimate=cost,
    )


def lm_head_matmul(x, weight, *, tm=None, tn=None, out_dtype=None,
                   vmem_limit_bytes=None):
    """x: [M, H], weight: [V, H] -> logits [M, V] via Pallas on the MXU."""
    M, H = x.shape
    V, H2 = weight.shape
    assert H == H2, "hidden dim mismatch"

    d_tm, d_tn, d_vmem = _default_tiling()
    tm = min(tm or d_tm, M)
    tn = min(tn or d_tn, V)
    vmem_limit_bytes = vmem_limit_bytes or d_vmem
    # Match torch.nn.functional.linear: logits dtype == activation dtype.
    # (bf16 logits also halve the [M, V] HBM write traffic vs f32.)
    out_dtype = x.dtype if out_dtype is None else out_dtype

    try:
        call = _build_lm_head_call(M, H, V, tm, tn, x.dtype, weight.dtype,
                                   out_dtype, vmem_limit_bytes,
                                   single_buffer_x=True)
        return call(x, weight)
    except Exception:
        # Fallback if this Pallas build rejects pipeline_mode=pl.Buffered(1).
        call = _build_lm_head_call(M, H, V, tm, tn, x.dtype, weight.dtype,
                                   out_dtype, vmem_limit_bytes,
                                   single_buffer_x=False)
        return call(x, weight)


def lm_pipe_layer_forward(hidden_states, labels, weight, *, tm=None, tn=None,
                          out_dtype=None):
    """Pallas equivalent of LMPipeLayer.forward((hidden_states, labels)).

    hidden_states: [seq, batch, hidden]
    labels       : passed through untouched
    weight       : [vocab, hidden]
    returns (logits [batch, seq, vocab], labels)
    """
    S, B, H = hidden_states.shape
    V = weight.shape[0]

    # Apply the (1,0,2) permute to hidden_states (S*B*H elements, ~V/H times
    # smaller than the logits) so the kernel writes [B*S, V] directly in the
    # final [batch, seq, vocab] order and no giant logits transpose is needed.
    # TODO(synk): fold this transpose into the kernel with a 3-D grid
    #             (B, S_tiles, V_tiles) and an x block of (ts, 1, H) once a
    #             second-minor block dim of 1 is confirmed on target Mosaic.
    x = jnp.transpose(hidden_states, (1, 0, 2)).reshape(B * S, H)

    logits_flat = lm_head_matmul(x, weight, tm=tm, tn=tn, out_dtype=out_dtype)
    logits = logits_flat.reshape(B, S, V)        # already batch-first
    return logits, labels


if __name__ == "__main__":
    # Small shapes consistent with the module's forward:
    # seq=8, batch=2, hidden=32, vocab=256.
    S, B, H, V = 8, 2, 32, 256

    key = jax.random.PRNGKey(0)
    k_h, k_w, k_l = jax.random.split(key, 3)

    # bf16 hidden states / embedding table = the intended fast path.
    hidden_states = jax.random.normal(k_h, (S, B, H), dtype=jnp.float32).astype(jnp.bfloat16)
    weight = (jax.random.normal(k_w, (V, H), dtype=jnp.float32) * 0.02).astype(jnp.bfloat16)
    labels = jax.random.randint(k_l, (B, S), 0, V, dtype=jnp.int32)

    logits, labels_out = lm_pipe_layer_forward(hidden_states, labels, weight)
    jax.block_until_ready(logits)
    jax.block_until_ready(labels_out)

    # Reference: exact f32 math on the same bf16 values, matching the PyTorch
    # semantics (linear with weight, then permute(1,0,2)).
    ref = jnp.einsum(
        "sbh,vh->sbv",
        hidden_states.astype(jnp.float32),
        weight.astype(jnp.float32),
        precision=lax.Precision.HIGHEST,
    ).transpose(1, 0, 2)

    assert logits.shape == (B, S, V)
    assert logits.dtype == hidden_states.dtype  # == bf16, like torch linear
    err = float(jnp.max(jnp.abs(logits.astype(jnp.float32) - ref)))
    assert jnp.allclose(logits.astype(jnp.float32), ref, atol=1e-2, rtol=2e-2), err
    assert (labels_out == labels).all()

    print("KERNEL_OK")
</pallas_src>

<mosaic_0001>
module attributes {stable_mosaic.version = 11 : i64} {
  func.func @_lm_head_kernel(%arg0: i32, %arg1: i32, %arg2: memref<16x32xbf16, #tpu.memory_space<vmem>>, %arg3: memref<256x32xbf16, #tpu.memory_space<vmem>>, %arg4: memref<16x256xbf16, #tpu.memory_space<vmem>>) attributes {dimension_semantics = [#tpu.dimension_semantics<parallel>, #tpu.dimension_semantics<parallel>], iteration_bounds = array<i64: 1, 1>, scalar_prefetch = 0 : i64, scratch_operands = 0 : i64, tpu.core_type = #tpu.core_type<tc>, window_params = [{pipeline_mode = #tpu.pipeline_mode<synchronous>, transform_indices = @transform_0, window_bounds = array<i64: 16, 32>}, {transform_indices = @transform_1, window_bounds = array<i64: 256, 32>}, {transform_indices = @transform_2, window_bounds = array<i64: 16, 256>}]} {
    %c0 = arith.constant 0 : index
    %c0_0 = arith.constant 0 : index
    %0 = vector.load %arg2[%c0, %c0_0] : memref<16x32xbf16, #tpu.memory_space<vmem>>, vector<16x32xbf16>
    %c0_1 = arith.constant 0 : index
    %c0_2 = arith.constant 0 : index
    %1 = vector.load %arg3[%c0_1, %c0_2] : memref<256x32xbf16, #tpu.memory_space<vmem>>, vector<256x32xbf16>
    %cst = arith.constant dense<0.000000e+00> : vector<16x256xf32>
    %2 = tpu.matmul %0, %1, %cst {dimension_numbers = #tpu.dot_dimension_numbers<[1], [1], [0], [0], [0, 0, 1, 0], [], []>} : vector<16x32xbf16>, vector<256x32xbf16>, vector<16x256xf32> -> vector<16x256xf32>
    %3 = arith.truncf %2 : vector<16x256xf32> to vector<16x256xbf16>
    %c0_3 = arith.constant 0 : index
    %c0_4 = arith.constant 0 : index
    %4 = vector.load %arg4[%c0_3, %c0_4] : memref<16x256xbf16, #tpu.memory_space<vmem>>, vector<16x256xbf16>
    tpu.vector_store %arg4[%c0_3, %c0_4], %3 {strides = array<i32>} : memref<16x256xbf16, #tpu.memory_space<vmem>>, vector<16x256xbf16>,
    return
  }
  func.func @transform_0(%arg0: i32, %arg1: i32) -> (i32, i32) {
    %c0_i32 = arith.constant 0 : i32
    %c0_i32_0 = arith.constant 0 : i32
    return %arg0, %c0_i32 : i32, i32
  }
  func.func @transform_1(%arg0: i32, %arg1: i32) -> (i32, i32) {
    %c0_i32 = arith.constant 0 : i32
    %c0_i32_0 = arith.constant 0 : i32
    return %arg1, %c0_i32 : i32, i32
  }
  func.func @transform_2(%arg0: i32, %arg1: i32) -> (i32, i32) {
    %c0_i32 = arith.constant 0 : i32
    return %arg0, %arg1 : i32, i32
  }
}

module attributes {stable_mosaic.version = 11 : i64} {
  func.func @_lm_head_kernel(%arg0: i32, %arg1: i32, %arg2: memref<16x32xbf16, #tpu.memory_space<vmem>>, %arg3: memref<256x32xbf16, #tpu.memory_space<vmem>>, %arg4: memref<16x256xbf16, #tpu.memory_space<vmem>>) attributes {dimension_semantics = [#tpu.dimension_semantics<parallel>, #tpu.dimension_semantics<parallel>], iteration_bounds = array<i64: 1, 1>, scalar_prefetch = 0 : i64, scratch_operands = 0 : i64, tpu.core_type = #tpu.core_type<tc>, window_params = [{transform_indices = @transform_0, window_bounds = array<i64: 16, 32>}, {transform_indices = @transform_1, window_bounds = array<i64: 256, 32>}, {transform_indices = @transform_2, window_bounds = array<i64: 16, 256>}]} {
    %c0 = arith.constant 0 : index
    %c0_0 = arith.constant 0 : index
    %0 = vector.load %arg2[%c0, %c0_0] : memref<16x32xbf16, #tpu.memory_space<vmem>>, vector<16x32xbf16>
    %c0_1 = arith.constant 0 : index
    %c0_2 = arith.constant 0 : index
    %1 = vector.load %arg3[%c0_1, %c0_2] : memref<256x32xbf16, #tpu.memory_space<vmem>>, vector<256x32xbf16>
    %cst = arith.constant dense<0.000000e+00> : vector<16x256xf32>
    %2 = tpu.matmul %0, %1, %cst {dimension_numbers = #tpu.dot_dimension_numbers<[1], [1], [0], [0], [0, 0, 1, 0], [], []>} : vector<16x32xbf16>, vector<256x32xbf16>, vector<16x256xf32> -> vector<16x256xf32>
    %3 = arith.truncf %2 : vector<16x256xf32> to vector<16x256xbf16>
    %c0_3 = arith.constant 0 : index
    %c0_4 = arith.constant 0 : index
    %4 = vector.load %arg4[%c0_3, %c0_4] : memref<16x256xbf16, #tpu.memory_space<vmem>>, vector<16x256xbf16>
    tpu.vector_store %arg4[%c0_3, %c0_4], %3 {strides = array<i32>} : memref<16x256xbf16, #tpu.memory_space<vmem>>, vector<16x256xbf16>,
    return
  }
  func.func @transform_0(%arg0: i32, %arg1: i32) -> (i32, i32) {
    %c0_i32 = arith.constant 0 : i32
    %c0_i32_0 = arith.constant 0 : i32
    return %arg0, %c0_i32 : i32, i32
  }
  func.func @transform_1(%arg0: i32, %arg1: i32) -> (i32, i32) {
    %c0_i32 = arith.constant 0 : i32
    %c0_i32_0 = arith.constant 0 : i32
    return %arg1, %c0_i32 : i32, i32
  }
  func.func @transform_2(%arg0: i32, %arg1: i32) -> (i32, i32) {
    %c0_i32 = arith.constant 0 : i32
    return %arg0, %arg1 : i32, i32
  }
}

</mosaic_0001>

<bundles_post_ra>
// kernel: tpu_custom_call.1
= control target key start
LH: loop header
LB: loop body
LE: loop exit
PB: predicated region body
PF: predicated region fallthrough
CT: control target
= control target key end

     0   :  { %vm132_vm0 = vcmask 261120   ;;  %s448_s0 = inlined_call_operand.vmem [shape: bf16[16,32], index: 0, kind: input, shape index: {}]   ;;  %s449_s1 = inlined_call_operand.vmem [shape: bf16[256,32], index: 1, kind: input, shape index: {}]   ;;  %s450_s2 = inlined_call_operand.hbm [shape: bf16[16,256], index: 2, kind: output, shape index: {}]  }
   0x1   :  { %v308_v0 = vld [vmem:[%s449_s1 + $0x40] sm:$0xff]   ;;  %v310_v2 = vld [vmem:[%s449_s1 + $0x48] sm:$0xff]   ;;  %v312_v6 = vld [vmem:[%s449_s1 + $0x50] sm:$0xff]  }
   0x2   :  { %v309_v1 = vld [vmem:[%s449_s1] sm:$0xff]   ;;  %297 = vmatprep.subr.msk.bf16.mxu0 %vm132_vm0, %v308_v0  ;;  %v311_v4 = vld [vmem:[%s449_s1 + $0x8] sm:$0xff]   ;;  %v313_v7 = vld [vmem:[%s449_s1 + $0x10] sm:$0xff]  }
   0x3   :  { %v137_v3 = vsel %vm132_vm0, %v309_v1, 0  ;;  %v140_v5 = vsel %vm132_vm0, %v311_v4, 0  ;;  %v324_v8 = vld [vmem:[%s448_s0] sm:$0xff]   ;;  %v143_v9 = vsel %vm132_vm0, %v313_v7, 0  ;;  %v314_v10 = vld [vmem:[%s449_s1 + $0x58] sm:$0xff]  }
   0x4   :  { %280 = vmatpush3.bf16.xpose.msra.mxu0 %v137_v3 }
   0x5   :  { %298 = vmatprep.subr.msk.bf16.mxu0 %vm132_vm0, %v310_v2 }
   0xc   :  { %282 = vmatpush3.bf16.xpose.msra.mxu0 %v140_v5 }
   0xd   :  { %299 = vmatprep.subr.msk.bf16.mxu0 %vm132_vm0, %v312_v6 }
   0xe   :  { %7 = vsyncpa [#allocation3], 0  ;;  %295 = vmatprep.mubr.msk.bf16.mxu0 %vm132_vm0, %v324_v8  ;;  %v315_v11 = vld [vmem:[%s449_s1 + $0x18] sm:$0xff]   ;;  %v316_v13 = vld [vmem:[%s449_s1 + $0x60] sm:$0xff]   ;;  %s349_s14 = smov [#allocation2]  }
   0xf   :  { %v146_v12 = vsel %vm132_vm0, %v315_v11, 0  ;;  %v317_v14 = vld [vmem:[%s449_s1 + $0x20] sm:$0xff]   ;;  %v318_v16 = vld [vmem:[%s449_s1 + $0x68] sm:$0xff]   ;;  %v320_v19 = vld [vmem:[%s449_s1 + $0x70] sm:$0xff]   ;;  %s246_s15 = sshll.u32 %s349_s14, 4  ;;  %s247_s15 = int_to_ptr.vmem [resolvable:$true] %s246_s15 }
  0x10   :  { %v149_v15 = vsel %vm132_vm0, %v317_v14, 0  ;;  %v319_v17 = vld [vmem:[%s449_s1 + $0x28] sm:$0xff]   ;;  %v321_v20 = vld [vmem:[%s449_s1 + $0x30] sm:$0xff]   ;;  %v322_v22 = vld [vmem:[%s449_s1 + $0x78] sm:$0xff]   ;;  %s325_s16 = scalar_lea.vmem %s247_s15, 256  ;;  %p330_p1 = scmp.lt.s32.totalorder %s247_s15, %s247_s15 }
  0x11   :  { %v152_v18 = vsel %vm132_vm0, %v319_v17, 0  ;;  %v155_v21 = vsel %vm132_vm0, %v321_v20, 0  ;;  %v323_v23 = vld [vmem:[%s449_s1 + $0x38] sm:$0xff]   ;;  %p326_p0 = scmp.ne.s32.totalorder %s247_s15, %s325_s16  ;;  %p331_p2 = scmp.lt.s32.totalorder %s325_s16, %s325_s16 }
  0x12   :  { %v158_v24 = vsel %vm132_vm0, %v323_v23, 0 }
  0x13   :  { %p332_p3 = por %p331_p2, %p330_p1 }
  0x14   :  { %284 = vmatpush3.bf16.xpose.msra.mxu0 %v143_v9 }
  0x15   :  { %300 = vmatprep.subr.msk.bf16.mxu0 %vm132_vm0, %v314_v10  ;;  %p333_p4 = pnand %p332_p3, %p326_p0 }
  0x1c   :  { %286 = vmatpush3.bf16.xpose.msra.mxu0 %v146_v12 }
  0x1d   :  { %301 = vmatprep.subr.msk.bf16.mxu0 %vm132_vm0, %v316_v13 }
  0x24   :  { %288 = vmatpush3.bf16.xpose.msra.mxu0 %v149_v15 }
  0x25   :  { %302 = vmatprep.subr.msk.bf16.mxu0 %vm132_vm0, %v318_v16 }
  0x2c   :  { %290 = vmatpush3.bf16.xpose.msra.mxu0 %v152_v18 }
  0x2d   :  { %303 = vmatprep.subr.msk.bf16.mxu0 %vm132_vm0, %v320_v19 }
  0x34   :  { %292 = vmatpush3.bf16.xpose.msra.mxu0 %v155_v21 }
  0x35   :  { %304 = vmatprep.subr.msk.bf16.mxu0 %vm132_vm0, %v322_v22 }
  0x3c   :  { %294 = vmatpush3.bf16.xpose.msra.mxu0 %v158_v24 }
  0x43   :  { %296 = vmatmul.mubr.msk.bf16.vlgmr.msra.gmra.mrb[0].mxu0 %vm132_vm0, %v324_v8 }
 0x116   :  { %v218_v25 = vpop.f32.mrb[0].mxu0 }
 0x117   :  { %v220_v26 = vpop.f32.mrb[1].mxu0 }
 0x118   :  { %v277_v27 = vpack.c.bf16 %v220_v26, %v218_v25  ;;  %v222_v28 = vpop.f32.mrb[2].mxu0 }
 0x119   :  { %v224_v29 = vpop.f32.mrb[3].mxu0 }
 0x11a   :  { %239 = vst [vmem:[#allocation2] sm:$0xff] %v277_v27  ;;  %v278_v30 = vpack.c.bf16 %v224_v29, %v222_v28 }
 0x11c   :  { %240 = vst [vmem:[#allocation2 + $0x8] sm:$0xff] %v278_v30 }
 0x11d   :  { %336 = shalt.err (!%p333_p4)
}
 0x11e   :  { %s337_s18 = scalar_lea.hbm %s450_s2, 256 }
 0x11f   :  { %p338_p5 = scmp.ne.s32.totalorder %s450_s2, %s337_s18  ;;  %p341_p6 = scmp.lt.u32.totalorder %s337_s18, %s450_s2 }
 0x121   :  { %p343_p7 = pnand %p341_p6, %p338_p5 }
 0x123   :  { %346 = shalt.err (!%p343_p7)
}
 0x124   :  { %s350_s23 = smov 128   ;;  %s351_s24 = smov 8  }
 0x125   :  { %252 = dma.vmem_to_hbm [thread:$0]  %s247_s15, 256, %s450_s2, [#allocation3], %s350_s23, %s350_s23, %s351_s24  }
 0x126   :  { %347 = dma.done.wait [#allocation3], 256  }
 0x127   :  { %348 = vsyncadd [#allocation3], 4294967040 }
 0x128   :  { %256 = vsyncpa [#allocation3], 1 }

// kernel: tpu_custom_call.1
= control target key start
LH: loop header
LB: loop body
LE: loop exit
PB: predicated region body
PF: predicated region fallthrough
CT: control target
= control target key end

     0   :  { %vm132_vm0 = vcmask 261120   ;;  %s448_s0 = inlined_call_operand.vmem [shape: bf16[16,32], index: 0, kind: input, shape index: {}]   ;;  %s449_s1 = inlined_call_operand.vmem [shape: bf16[256,32], index: 1, kind: input, shape index: {}]   ;;  %s450_s2 = inlined_call_operand.hbm [shape: bf16[16,256], index: 2, kind: output, shape index: {}]  }
   0x1   :  { %v308_v0 = vld [vmem:[%s449_s1 + $0x40] sm:$0xff]   ;;  %v310_v2 = vld [vmem:[%s449_s1 + $0x48] sm:$0xff]   ;;  %v312_v6 = vld [vmem:[%s449_s1 + $0x50] sm:$0xff]  }
   0x2   :  { %v309_v1 = vld [vmem:[%s449_s1] sm:$0xff]   ;;  %297 = vmatprep.subr.msk.bf16.mxu0 %vm132_vm0, %v308_v0  ;;  %v311_v4 = vld [vmem:[%s449_s1 + $0x8] sm:$0xff]   ;;  %v313_v7 = vld [vmem:[%s449_s1 + $0x10] sm:$0xff]  }
   0x3   :  { %v137_v3 = vsel %vm132_vm0, %v309_v1, 0  ;;  %v140_v5 = vsel %vm132_vm0, %v311_v4, 0  ;;  %v324_v8 = vld [vmem:[%s448_s0] sm:$0xff]   ;;  %v143_v9 = vsel %vm132_vm0, %v313_v7, 0  ;;  %v314_v10 = vld [vmem:[%s449_s1 + $0x58] sm:$0xff]  }
   0x4   :  { %280 = vmatpush3.bf16.xpose.msra.mxu0 %v137_v3 }
   0x5   :  { %298 = vmatprep.subr.msk.bf16.mxu0 %vm132_vm0, %v310_v2 }
   0xc   :  { %282 = vmatpush3.bf16.xpose.msra.mxu0 %v140_v5 }
   0xd   :  { %299 = vmatprep.subr.msk.bf16.mxu0 %vm132_vm0, %v312_v6 }
   0xe   :  { %7 = vsyncpa [#allocation3], 0  ;;  %295 = vmatprep.mubr.msk.bf16.mxu0 %vm132_vm0, %v324_v8  ;;  %v315_v11 = vld [vmem:[%s449_s1 + $0x18] sm:$0xff]   ;;  %v316_v13 = vld [vmem:[%s449_s1 + $0x60] sm:$0xff]   ;;  %s349_s14 = smov [#allocation2]  }
   0xf   :  { %v146_v12 = vsel %vm132_vm0, %v315_v11, 0  ;;  %v317_v14 = vld [vmem:[%s449_s1 + $0x20] sm:$0xff]   ;;  %v318_v16 = vld [vmem:[%s449_s1 + $0x68] sm:$0xff]   ;;  %v320_v19 = vld [vmem:[%s449_s1 + $0x70] sm:$0xff]   ;;  %s246_s15 = sshll.u32 %s349_s14, 4  ;;  %s247_s15 = int_to_ptr.vmem [resolvable:$true] %s246_s15 }
  0x10   :  { %v149_v15 = vsel %vm132_vm0, %v317_v14, 0  ;;  %v319_v17 = vld [vmem:[%s449_s1 + $0x28] sm:$0xff]   ;;  %v321_v20 = vld [vmem:[%s449_s1 + $0x30] sm:$0xff]   ;;  %v322_v22 = vld [vmem:[%s449_s1 + $0x78] sm:$0xff]   ;;  %s325_s16 = scalar_lea.vmem %s247_s15, 256  ;;  %p330_p1 = scmp.lt.s32.totalorder %s247_s15, %s247_s15 }
  0x11   :  { %v152_v18 = vsel %vm132_vm0, %v319_v17, 0  ;;  %v155_v21 = vsel %vm132_vm0, %v321_v20, 0  ;;  %v323_v23 = vld [vmem:[%s449_s1 + $0x38] sm:$0xff]   ;;  %p326_p0 = scmp.ne.s32.totalorder %s247_s15, %s325_s16  ;;  %p331_p2 = scmp.lt.s32.totalorder %s325_s16, %s325_s16 }
  0x12   :  { %v158_v24 = vsel %vm132_vm0, %v323_v23, 0 }
  0x13   :  { %p332_p3 = por %p331_p2, %p330_p1 }
  0x14   :  { %284 = vmatpush3.bf16.xpose.msra.mxu0 %v143_v9 }
  0x15   :  { %300 = vmatprep.subr.msk.bf16.mxu0 %vm132_vm0, %v314_v10  ;;  %p333_p4 = pnand %p332_p3, %p326_p0 }
  0x1c   :  { %286 = vmatpush3.bf16.xpose.msra.mxu0 %v146_v12 }
  0x1d   :  { %301 = vmatprep.subr.msk.bf16.mxu0 %vm132_vm0, %v316_v13 }
  0x24   :  { %288 = vmatpush3.bf16.xpose.msra.mxu0 %v149_v15 }
  0x25   :  { %302 = vmatprep.subr.msk.bf16.mxu0 %vm132_vm0, %v318_v16 }
  0x2c   :  { %290 = vmatpush3.bf16.xpose.msra.mxu0 %v152_v18 }
  0x2d   :  { %303 = vmatprep.subr.msk.bf16.mxu0 %vm132_vm0, %v320_v19 }
  0x34   :  { %292 = vmatpush3.bf16.xpose.msra.mxu0 %v155_v21 }
  0x35   :  { %304 = vmatprep.subr.msk.bf16.mxu0 %vm132_vm0, %v322_v22 }
  0x3c   :  { %294 = vmatpush3.bf16.xpose.msra.mxu0 %v158_v24 }
  0x43   :  { %296 = vmatmul.mubr.msk.bf16.vlgmr.msra.gmra.mrb[0].mxu0 %vm132_vm0, %v324_v8 }
 0x116   :  { %v218_v25 = vpop.f32.mrb[0].mxu0 }
 0x117   :  { %v220_v26 = vpop.f32.mrb[1].mxu0 }
 0x118   :  { %v277_v27 = vpack.c.bf16 %v220_v26, %v218_v25  ;;  %v222_v28 = vpop.f32.mrb[2].mxu0 }
 0x119   :  { %v224_v29 = vpop.f32.mrb[3].mxu0 }
 0x11a   :  { %239 = vst [vmem:[#allocation2] sm:$0xff] %v277_v27  ;;  %v278_v30 = vpack.c.bf16 %v224_v29, %v222_v28 }
 0x11c   :  { %240 = vst [vmem:[#allocation2 + $0x8] sm:$0xff] %v278_v30 }
 0x11d   :  { %336 = shalt.err (!%p333_p4)
}
 0x11e   :  { %s337_s18 = scalar_lea.hbm %s450_s2, 256 }
 0x11f   :  { %p338_p5 = scmp.ne.s32.totalorder %s450_s2, %s337_s18  ;;  %p341_p6 = scmp.lt.u32.totalorder %s337_s18, %s450_s2 }
 0x121   :  { %p343_p7 = pnand %p341_p6, %p338_p5 }
 0x123   :  { %346 = shalt.err (!%p343_p7)
}
 0x124   :  { %s350_s23 = smov 128   ;;  %s351_s24 = smov 8  }
 0x125   :  { %252 = dma.vmem_to_hbm [thread:$0]  %s247_s15, 256, %s450_s2, [#allocation3], %s350_s23, %s350_s23, %s351_s24  }
 0x126   :  { %347 = dma.done.wait [#allocation3], 256  }
 0x127   :  { %348 = vsyncadd [#allocation3], 4294967040 }
 0x128   :  { %256 = vsyncpa [#allocation3], 1 }

</bundles_post_ra>
